<compile_context>
chip_gen: v7x
topology: tpu7x:2x2x1
jax: 0.10.0
libtpu: 0.0.40
codegen_flags: <defaults>
</compile_context>

<pallas_src>
import functools

import jax
import jax.numpy as jnp
from jax import lax
from jax.experimental import pallas as pl
from jax.experimental.pallas import tpu as pltpu


def _round_up(a, b):
    return (a + b - 1) // b * b


def _const_spec(shape):
    zeros = (0,) * len(shape)
    return pl.BlockSpec(shape, lambda n: zeros)


def _down_block_kernel(*refs, C_in, K, W, HW, norm, pool, eps, slope):
    it = iter(refs)
    w_ref = next(it)                      # (C_out, C_pad*K*K)   conv weights, zero-padded chans
    pr_ref = next(it)                     # (C_out, 3)           [bias, gamma, beta]
    nv_ref = next(it) if norm else None   # (1, M_pad)           valid / (OH*OW), 0 on junk cols
    sp_ref = next(it) if pool else None   # (M_pad, OP_pad)      fused select + 2x2 avg-pool
    x_ref = next(it)                      # (1, C_in, HW)        un-padded input view
    o_ref = next(it)                      # (1, C_out, OUT_W)
    xp_ref = next(it)                     # (C_pad, L_pad)       zero-padded staging scratch
    patches_ref = next(it)                # (C_pad*K*K, M_pad)   im2col scratch

    C_pad = xp_ref.shape[0]
    M_pad = patches_ref.shape[1]

    # ---- stage x into a zero-padded buffer (8-sublane channel pad + spatial tail pad) ------
    xp_ref[...] = jnp.zeros_like(xp_ref)
    xp_ref[0:C_in, 0:HW] = x_ref[0].astype(jnp.float32)

    # ---- im2col: one aligned, unmasked full-(8,128)-tile slab store per conv tap -----------
    # patches[(kh*K+kw)*C_pad + ci, m] = x[ci, oh+kh, ow+kw]  for m = oh*W + ow
    for kh in range(K):
        for kw in range(K):
            off = kh * W + kw
            r0 = (kh * K + kw) * C_pad
            patches_ref[r0:r0 + C_pad, :] = xp_ref[:, off:off + M_pad]

    # ---- conv for all output channels: a single MXU matmul ---------------------------------
    acc = jnp.dot(w_ref[...], patches_ref[...],
                  preferred_element_type=jnp.float32)            # (C_out, M_pad)

    params = pr_ref[...]                                         # (C_out, 3)
    if norm:
        # InstanceNorm2d (affine, biased variance) over the valid columns only.
        # Conv bias is cancelled by the mean subtraction -> intentionally skipped.
        nv = nv_ref[...]                                         # (1, M_pad)
        mean = jnp.sum(acc * nv, axis=1, keepdims=True)          # (C_out, 1)
        cen = acc - mean
        var = jnp.sum((cen * cen) * nv, axis=1, keepdims=True)   # (C_out, 1)
        acc = cen * lax.rsqrt(var + eps)
        acc = acc * params[:, 1:2] + params[:, 2:3]              # gamma, beta
    else:
        acc = acc + params[:, 0:1]                               # bias

    # ---- leaky_relu(0.2) --------------------------------------------------------------------
    acc = jnp.where(acc > 0, acc, slope * acc)

    # ---- fused selection + avg_pool2d((2,2)) as one projection matmul ------------------------
    if pool:
        acc = jnp.dot(acc, sp_ref[...], preferred_element_type=jnp.float32)   # (C_out, OP_pad)

    o_ref[0] = acc.astype(o_ref.dtype)


def down_block2d(x, weight, bias, gamma, beta, *, norm=False, pool=False,
                 negative_slope=0.2, eps=1e-5):
    N, C_in, H, W = x.shape
    C_out, C_in_w, K, K2 = weight.shape
    assert C_in_w == C_in and K == K2
    OH, OW = H - K + 1, W - K + 1
    PH, PW = OH // 2, OW // 2
    HW = H * W
    M = OH * W                                   # conv rows flattened with row stride W
    M_pad = _round_up(M, 128)                    # lane-dense patch / slab width
    C_pad = _round_up(C_in, 8)                   # sublane-dense channels
    CKKp = C_pad * K * K
    L_pad = _round_up((K - 1) * W + (K - 1) + M_pad, 128)
    OP = PH * PW
    OP_pad = _round_up(max(OP, 1), 128)
    OUT_W = OP_pad if pool else M_pad

    # --- constant plumbing (tiny, built once in the wrapper) ---
    # weight (C_out, C_in, K, K) -> (C_out, K*K*C_pad), column index = tap*C_pad + ci
    w_mat = jnp.transpose(weight.astype(jnp.float32), (0, 2, 3, 1))          # (C_out, K, K, C_in)
    w_mat = jnp.pad(w_mat, ((0, 0), (0, 0), (0, 0), (0, C_pad - C_in))).reshape(C_out, CKKp)
    params = jnp.stack([bias, gamma, beta], axis=1).astype(jnp.float32)      # (C_out, 3)

    m_idx = jnp.arange(M_pad)
    oh, ow = m_idx // W, m_idx % W
    valid = (m_idx < M) & (ow < OW)

    inputs = [w_mat, params]
    in_specs = [_const_spec(w_mat.shape), _const_spec(params.shape)]
    if norm:
        nv = (valid.astype(jnp.float32) / float(OH * OW)).reshape(1, M_pad)
        inputs.append(nv)
        in_specs.append(_const_spec(nv.shape))
    if pool:
        ph, pw = oh // 2, ow // 2
        pv = valid & (ph < PH) & (pw < PW)
        tgt = ph * PW + pw
        cols = jnp.arange(OP_pad)
        sp = (pv[:, None] & (tgt[:, None] == cols[None, :])).astype(jnp.float32) * 0.25
        inputs.append(sp)
        in_specs.append(_const_spec(sp.shape))

    x3 = x.reshape(N, C_in, HW)                  # contiguous view: no wrapper pad / copy of x
    inputs.append(x3)
    in_specs.append(pl.BlockSpec((1, C_in, HW), lambda n: (n, 0, 0)))

    kernel = functools.partial(_down_block_kernel, C_in=C_in, K=K, W=W, HW=HW,
                               norm=norm, pool=pool, eps=eps, slope=negative_slope)

    flops = 2 * N * C_out * CKKp * M_pad + (2 * N * C_out * M_pad * OP_pad if pool else 0)
    bytes_accessed = 4 * (int(x3.size) + int(w_mat.size) + N * C_out * OUT_W
                          + (M_pad * OP_pad if pool else 0) + (M_pad if norm else 0))

    out_flat = pl.pallas_call(
        kernel,
        out_shape=jax.ShapeDtypeStruct((N, C_out, OUT_W), x.dtype),
        grid=(N,),
        in_specs=in_specs,
        out_specs=pl.BlockSpec((1, C_out, OUT_W), lambda n: (n, 0, 0)),
        scratch_shapes=[pltpu.VMEM((C_pad, L_pad), jnp.float32),
                        pltpu.VMEM((CKKp, M_pad), jnp.float32)],
        compiler_params=pltpu.CompilerParams(dimension_semantics=("parallel",)),
        cost_estimate=pl.CostEstimate(flops=int(flops),
                                      transcendentals=N * C_out if norm else 0,
                                      bytes_accessed=int(bytes_accessed)),
    )(*inputs)

    if pool:
        return out_flat[:, :, :OP].reshape(N, C_out, PH, PW)
    return out_flat[:, :, :M].reshape(N, C_out, OH, W)[:, :, :, :OW]


def _reference(x, weight, bias, gamma, beta, *, norm, pool, eps=1e-5, slope=0.2):
    out = lax.conv_general_dilated(
        x.astype(jnp.float32), weight.astype(jnp.float32),
        window_strides=(1, 1), padding="VALID",
        dimension_numbers=("NCHW", "OIHW", "NCHW"))
    out = out + bias[None, :, None, None]
    if norm:
        mean = out.mean(axis=(2, 3), keepdims=True)
        var = ((out - mean) ** 2).mean(axis=(2, 3), keepdims=True)
        out = (out - mean) / jnp.sqrt(var + eps)
        out = out * gamma[None, :, None, None] + beta[None, :, None, None]
    out = jnp.where(out > 0, out, slope * out)
    if pool:
        n, c, h, w = out.shape
        h2, w2 = (h // 2) * 2, (w // 2) * 2
        out = out[:, :, :h2, :w2].reshape(n, c, h2 // 2, 2, w2 // 2, 2).mean(axis=(3, 5))
    return out


if __name__ == "__main__":
    key = jax.random.PRNGKey(0)
    kx, kw, kb, kg, kbt = jax.random.split(key, 5)

    N, C_in, H, W = 2, 4, 16, 16
    C_out, K = 8, 4

    x = jax.random.normal(kx, (N, C_in, H, W), dtype=jnp.float32)
    weight = jax.random.normal(kw, (C_out, C_in, K, K), dtype=jnp.float32) * 0.1
    bias = jax.random.normal(kb, (C_out,), dtype=jnp.float32) * 0.1
    gamma = 1.0 + 0.1 * jax.random.normal(kg, (C_out,), dtype=jnp.float32)
    beta = 0.1 * jax.random.normal(kbt, (C_out,), dtype=jnp.float32)

    # TODO(synk): spectral_norm (sn=True) is a parameter reparameterization, not forward
    # compute; it is omitted (equivalent to sn=False).

    # Config 1: module defaults (norm=False, pool=False)  -> conv + leaky_relu
    out1 = jax.block_until_ready(down_block2d(x, weight, bias, gamma, beta,
                                              norm=False, pool=False))
    ref1 = _reference(x, weight, bias, gamma, beta, norm=False, pool=False)
    assert out1.shape == (N, C_out, H - K + 1, W - K + 1)
    assert jnp.allclose(out1, ref1, atol=1e-4, rtol=1e-4)

    # Config 2: norm=True, pool=True -> conv + instance norm + leaky_relu + 2x2 avg pool
    out2 = jax.block_until_ready(down_block2d(x, weight, bias, gamma, beta,
                                              norm=True, pool=True))
    ref2 = _reference(x, weight, bias, gamma, beta, norm=True, pool=True)
    assert out2.shape == (N, C_out, (H - K + 1) // 2, (W - K + 1) // 2)
    assert jnp.allclose(out2, ref2, atol=1e-4, rtol=1e-4)

    print("KERNEL_OK")
</pallas_src>

<mosaic_0001>
module attributes {stable_mosaic.version = 11 : i64} {
  func.func @_down_block_kernel(%arg0: i32, %arg1: memref<8x128xf32, #tpu.memory_space<vmem>>, %arg2: memref<8x3xf32, #tpu.memory_space<vmem>>, %arg3: memref<1x4x256xf32, #tpu.memory_space<vmem>>, %arg4: memref<1x8x256xf32, #tpu.memory_space<vmem>>, %arg5: memref<8x384xf32, #tpu.memory_space<vmem>>, %arg6: memref<128x256xf32, #tpu.memory_space<vmem>>) attributes {dimension_semantics = [#tpu.dimension_semantics<parallel>], iteration_bounds = array<i64: 2>, scalar_prefetch = 0 : i64, scratch_operands = 2 : i64, tpu.core_type = #tpu.core_type<tc>, window_params = [{pipeline_mode = #tpu.pipeline_mode<synchronous>, transform_indices = @transform_0, window_bounds = array<i64: 8, 128>}, {pipeline_mode = #tpu.pipeline_mode<synchronous>, transform_indices = @transform_1, window_bounds = array<i64: 8, 3>}, {transform_indices = @transform_2, window_bounds = array<i64: 1, 4, 256>}, {transform_indices = @transform_3, window_bounds = array<i64: 1, 8, 256>}]} {
    %cst = arith.constant 0.000000e+00 : f32
    %0 = vector.broadcast %cst : f32 to vector<8x384xf32>
    %c0 = arith.constant 0 : index
    %c0_0 = arith.constant 0 : index
    %1 = vector.load %arg5[%c0, %c0_0] : memref<8x384xf32, #tpu.memory_space<vmem>>, vector<8x384xf32>
    tpu.vector_store %arg5[%c0, %c0_0], %0 {strides = array<i32>} : memref<8x384xf32, #tpu.memory_space<vmem>>, vector<8x384xf32>,
    %c0_1 = arith.constant 0 : index
    %c0_2 = arith.constant 0 : index
    %c0_3 = arith.constant 0 : index
    %2 = vector.load %arg3[%c0_1, %c0_2, %c0_3] : memref<1x4x256xf32, #tpu.memory_space<vmem>>, vector<1x4x256xf32>
    %3 = vector.shape_cast %2 : vector<1x4x256xf32> to vector<4x256xf32>
    %c0_4 = arith.constant 0 : index
    %c0_5 = arith.constant 0 : index
    %4 = vector.load %arg5[%c0_4, %c0_5] : memref<8x384xf32, #tpu.memory_space<vmem>>, vector<4x256xf32>
    tpu.vector_store %arg5[%c0_4, %c0_5], %3 {strides = array<i32>} : memref<8x384xf32, #tpu.memory_space<vmem>>, vector<4x256xf32>,
    %c0_6 = arith.constant 0 : index
    %c0_7 = arith.constant 0 : index
    %5 = vector.load %arg5[%c0_6, %c0_7] : memref<8x384xf32, #tpu.memory_space<vmem>>, vector<8x256xf32>
    %c0_8 = arith.constant 0 : index
    %c0_9 = arith.constant 0 : index
    %6 = vector.load %arg6[%c0_8, %c0_9] : memref<128x256xf32, #tpu.memory_space<vmem>>, vector<8x256xf32>
    tpu.vector_store %arg6[%c0_8, %c0_9], %5 {strides = array<i32>} : memref<128x256xf32, #tpu.memory_space<vmem>>, vector<8x256xf32>,
    %c0_10 = arith.constant 0 : index
    %c1 = arith.constant 1 : index
    %7 = vector.load %arg5[%c0_10, %c1] : memref<8x384xf32, #tpu.memory_space<vmem>>, vector<8x256xf32>
    %c8 = arith.constant 8 : index
    %c0_11 = arith.constant 0 : index
    %8 = vector.load %arg6[%c8, %c0_11] : memref<128x256xf32, #tpu.memory_space<vmem>>, vector<8x256xf32>
    tpu.vector_store %arg6[%c8, %c0_11], %7 {strides = array<i32>} : memref<128x256xf32, #tpu.memory_space<vmem>>, vector<8x256xf32>,
    %c0_12 = arith.constant 0 : index
    %c2 = arith.constant 2 : index
    %9 = vector.load %arg5[%c0_12, %c2] : memref<8x384xf32, #tpu.memory_space<vmem>>, vector<8x256xf32>
    %c16 = arith.constant 16 : index
    %c0_13 = arith.constant 0 : index
    %10 = vector.load %arg6[%c16, %c0_13] : memref<128x256xf32, #tpu.memory_space<vmem>>, vector<8x256xf32>
    tpu.vector_store %arg6[%c16, %c0_13], %9 {strides = array<i32>} : memref<128x256xf32, #tpu.memory_space<vmem>>, vector<8x256xf32>,
    %c0_14 = arith.constant 0 : index
    %c3 = arith.constant 3 : index
    %11 = vector.load %arg5[%c0_14, %c3] : memref<8x384xf32, #tpu.memory_space<vmem>>, vector<8x256xf32>
    %c24 = arith.constant 24 : index
    %c0_15 = arith.constant 0 : index
    %12 = vector.load %arg6[%c24, %c0_15] : memref<128x256xf32, #tpu.memory_space<vmem>>, vector<8x256xf32>
    tpu.vector_store %arg6[%c24, %c0_15], %11 {strides = array<i32>} : memref<128x256xf32, #tpu.memory_space<vmem>>, vector<8x256xf32>,
    %c0_16 = arith.constant 0 : index
    %c16_17 = arith.constant 16 : index
    %13 = vector.load %arg5[%c0_16, %c16_17] : memref<8x384xf32, #tpu.memory_space<vmem>>, vector<8x256xf32>
    %c32 = arith.constant 32 : index
    %c0_18 = arith.constant 0 : index
    %14 = vector.load %arg6[%c32, %c0_18] : memref<128x256xf32, #tpu.memory_space<vmem>>, vector<8x256xf32>
    tpu.vector_store %arg6[%c32, %c0_18], %13 {strides = array<i32>} : memref<128x256xf32, #tpu.memory_space<vmem>>, vector<8x256xf32>,
    %c0_19 = arith.constant 0 : index
    %c17 = arith.constant 17 : index
    %15 = vector.load %arg5[%c0_19, %c17] : memref<8x384xf32, #tpu.memory_space<vmem>>, vector<8x256xf32>
    %c40 = arith.constant 40 : index
    %c0_20 = arith.constant 0 : index
    %16 = vector.load %arg6[%c40, %c0_20] : memref<128x256xf32, #tpu.memory_space<vmem>>, vector<8x256xf32>
    tpu.vector_store %arg6[%c40, %c0_20], %15 {strides = array<i32>} : memref<128x256xf32, #tpu.memory_space<vmem>>, vector<8x256xf32>,
    %c0_21 = arith.constant 0 : index
    %c18 = arith.constant 18 : index
    %17 = vector.load %arg5[%c0_21, %c18] : memref<8x384xf32, #tpu.memory_space<vmem>>, vector<8x256xf32>
    %c48 = arith.constant 48 : index
    %c0_22 = arith.constant 0 : index
    %18 = vector.load %arg6[%c48, %c0_22] : memref<128x256xf32, #tpu.memory_space<vmem>>, vector<8x256xf32>
    tpu.vector_store %arg6[%c48, %c0_22], %17 {strides = array<i32>} : memref<128x256xf32, #tpu.memory_space<vmem>>, vector<8x256xf32>,
    %c0_23 = arith.constant 0 : index
    %c19 = arith.constant 19 : index
    %19 = vector.load %arg5[%c0_23, %c19] : memref<8x384xf32, #tpu.memory_space<vmem>>, vector<8x256xf32>
    %c56 = arith.constant 56 : index
    %c0_24 = arith.constant 0 : index
    %20 = vector.load %arg6[%c56, %c0_24] : memref<128x256xf32, #tpu.memory_space<vmem>>, vector<8x256xf32>
    tpu.vector_store %arg6[%c56, %c0_24], %19 {strides = array<i32>} : memref<128x256xf32, #tpu.memory_space<vmem>>, vector<8x256xf32>,
    %c0_25 = arith.constant 0 : index
    %c32_26 = arith.constant 32 : index
    %21 = vector.load %arg5[%c0_25, %c32_26] : memref<8x384xf32, #tpu.memory_space<vmem>>, vector<8x256xf32>
    %c64 = arith.constant 64 : index
    %c0_27 = arith.constant 0 : index
    %22 = vector.load %arg6[%c64, %c0_27] : memref<128x256xf32, #tpu.memory_space<vmem>>, vector<8x256xf32>
    tpu.vector_store %arg6[%c64, %c0_27], %21 {strides = array<i32>} : memref<128x256xf32, #tpu.memory_space<vmem>>, vector<8x256xf32>,
    %c0_28 = arith.constant 0 : index
    %c33 = arith.constant 33 : index
    %23 = vector.load %arg5[%c0_28, %c33] : memref<8x384xf32, #tpu.memory_space<vmem>>, vector<8x256xf32>
    %c72 = arith.constant 72 : index
    %c0_29 = arith.constant 0 : index
    %24 = vector.load %arg6[%c72, %c0_29] : memref<128x256xf32, #tpu.memory_space<vmem>>, vector<8x256xf32>
    tpu.vector_store %arg6[%c72, %c0_29], %23 {strides = array<i32>} : memref<128x256xf32, #tpu.memory_space<vmem>>, vector<8x256xf32>,
    %c0_30 = arith.constant 0 : index
    %c34 = arith.constant 34 : index
    %25 = vector.load %arg5[%c0_30, %c34] : memref<8x384xf32, #tpu.memory_space<vmem>>, vector<8x256xf32>
    %c80 = arith.constant 80 : index
    %c0_31 = arith.constant 0 : index
    %26 = vector.load %arg6[%c80, %c0_31] : memref<128x256xf32, #tpu.memory_space<vmem>>, vector<8x256xf32>
    tpu.vector_store %arg6[%c80, %c0_31], %25 {strides = array<i32>} : memref<128x256xf32, #tpu.memory_space<vmem>>, vector<8x256xf32>,
    %c0_32 = arith.constant 0 : index
    %c35 = arith.constant 35 : index
    %27 = vector.load %arg5[%c0_32, %c35] : memref<8x384xf32, #tpu.memory_space<vmem>>, vector<8x256xf32>
    %c88 = arith.constant 88 : index
    %c0_33 = arith.constant 0 : index
    %28 = vector.load %arg6[%c88, %c0_33] : memref<128x256xf32, #tpu.memory_space<vmem>>, vector<8x256xf32>
    tpu.vector_store %arg6[%c88, %c0_33], %27 {strides = array<i32>} : memref<128x256xf32, #tpu.memory_space<vmem>>, vector<8x256xf32>,
    %c0_34 = arith.constant 0 : index
    %c48_35 = arith.constant 48 : index
    %29 = vector.load %arg5[%c0_34, %c48_35] : memref<8x384xf32, #tpu.memory_space<vmem>>, vector<8x256xf32>
    %c96 = arith.constant 96 : index
    %c0_36 = arith.constant 0 : index
    %30 = vector.load %arg6[%c96, %c0_36] : memref<128x256xf32, #tpu.memory_space<vmem>>, vector<8x256xf32>
    tpu.vector_store %arg6[%c96, %c0_36], %29 {strides = array<i32>} : memref<128x256xf32, #tpu.memory_space<vmem>>, vector<8x256xf32>,
    %c0_37 = arith.constant 0 : index
    %c49 = arith.constant 49 : index
    %31 = vector.load %arg5[%c0_37, %c49] : memref<8x384xf32, #tpu.memory_space<vmem>>, vector<8x256xf32>
    %c104 = arith.constant 104 : index
    %c0_38 = arith.constant 0 : index
    %32 = vector.load %arg6[%c104, %c0_38] : memref<128x256xf32, #tpu.memory_space<vmem>>, vector<8x256xf32>
    tpu.vector_store %arg6[%c104, %c0_38], %31 {strides = array<i32>} : memref<128x256xf32, #tpu.memory_space<vmem>>, vector<8x256xf32>,
    %c0_39 = arith.constant 0 : index
    %c50 = arith.constant 50 : index
    %33 = vector.load %arg5[%c0_39, %c50] : memref<8x384xf32, #tpu.memory_space<vmem>>, vector<8x256xf32>
    %c112 = arith.constant 112 : index
    %c0_40 = arith.constant 0 : index
    %34 = vector.load %arg6[%c112, %c0_40] : memref<128x256xf32, #tpu.memory_space<vmem>>, vector<8x256xf32>
    tpu.vector_store %arg6[%c112, %c0_40], %33 {strides = array<i32>} : memref<128x256xf32, #tpu.memory_space<vmem>>, vector<8x256xf32>,
    %c0_41 = arith.constant 0 : index
    %c51 = arith.constant 51 : index
    %35 = vector.load %arg5[%c0_41, %c51] : memref<8x384xf32, #tpu.memory_space<vmem>>, vector<8x256xf32>
    %c120 = arith.constant 120 : index
    %c0_42 = arith.constant 0 : index
    %36 = vector.load %arg6[%c120, %c0_42] : memref<128x256xf32, #tpu.memory_space<vmem>>, vector<8x256xf32>
    tpu.vector_store %arg6[%c120, %c0_42], %35 {strides = array<i32>} : memref<128x256xf32, #tpu.memory_space<vmem>>, vector<8x256xf32>,
    %c0_43 = arith.constant 0 : index
    %c0_44 = arith.constant 0 : index
    %37 = vector.load %arg1[%c0_43, %c0_44] : memref<8x128xf32, #tpu.memory_space<vmem>>, vector<8x128xf32>
    %c0_45 = arith.constant 0 : index
    %c0_46 = arith.constant 0 : index
    %38 = vector.load %arg6[%c0_45, %c0_46] : memref<128x256xf32, #tpu.memory_space<vmem>>, vector<128x256xf32>
    %cst_47 = arith.constant dense<0.000000e+00> : vector<8x256xf32>
    %39 = tpu.matmul %37, %38, %cst_47 {dimension_numbers = #tpu.dot_dimension_numbers<[1], [0], [0], [1], [0, 0, 1, 1], [], []>} : vector<8x128xf32>, vector<128x256xf32>, vector<8x256xf32> -> vector<8x256xf32>
    %c0_48 = arith.constant 0 : index
    %c0_49 = arith.constant 0 : index
    %40 = vector.load %arg2[%c0_48, %c0_49] : memref<8x3xf32, #tpu.memory_space<vmem>>, vector<8x3xf32>
    %41 = vector.extract_strided_slice %40 {offsets = [0, 0], sizes = [8, 1], strides = [1, 1]} : vector<8x3xf32> to vector<8x1xf32>
    %42 = vector.broadcast %41 : vector<8x1xf32> to vector<8x256xf32>
    %43 = arith.addf %39, %42 : vector<8x256xf32>
    %cst_50 = arith.constant 0.000000e+00 : f32
    %44 = vector.broadcast %cst_50 : f32 to vector<8x256xf32>
    %45 = arith.cmpf ogt, %43, %44 : vector<8x256xf32>
    %cst_51 = arith.constant 2.000000e-01 : f32
    %46 = vector.broadcast %cst_51 : f32 to vector<8x256xf32>
    %47 = arith.mulf %46, %43 : vector<8x256xf32>
    %48 = arith.select %45, %43, %47 : vector<8x256xi1>, vector<8x256xf32>
    %c0_52 = arith.constant 0 : index
    %c0_53 = arith.constant 0 : index
    %c0_54 = arith.constant 0 : index
    %49 = vector.load %arg4[%c0_52, %c0_53, %c0_54] : memref<1x8x256xf32, #tpu.memory_space<vmem>>, vector<1x8x256xf32>
    %50 = vector.shape_cast %49 : vector<1x8x256xf32> to vector<8x256xf32>
    %51 = vector.shape_cast %48 : vector<8x256xf32> to vector<1x8x256xf32>
    tpu.vector_store %arg4[%c0_52, %c0_53, %c0_54], %51 {strides = array<i32>} : memref<1x8x256xf32, #tpu.memory_space<vmem>>, vector<1x8x256xf32>,
    return
  }
  func.func @transform_0(%arg0: i32) -> (i32, i32) {
    %c0_i32 = arith.constant 0 : i32
    %c0_i32_0 = arith.constant 0 : i32
    %c0_i32_1 = arith.constant 0 : i32
    return %c0_i32, %c0_i32_0 : i32, i32
  }
  func.func @transform_1(%arg0: i32) -> (i32, i32) {
    %c0_i32 = arith.constant 0 : i32
    %c0_i32_0 = arith.constant 0 : i32
    %c0_i32_1 = arith.constant 0 : i32
    return %c0_i32, %c0_i32_0 : i32, i32
  }
  func.func @transform_2(%arg0: i32) -> (i32, i32, i32) {
    %c0_i32 = arith.constant 0 : i32
    %c0_i32_0 = arith.constant 0 : i32
    %c0_i32_1 = arith.constant 0 : i32
    return %arg0, %c0_i32, %c0_i32_0 : i32, i32, i32
  }
  func.func @transform_3(%arg0: i32) -> (i32, i32, i32) {
    %c0_i32 = arith.constant 0 : i32
    %c0_i32_0 = arith.constant 0 : i32
    %c0_i32_1 = arith.constant 0 : i32
    return %arg0, %c0_i32, %c0_i32_0 : i32, i32, i32
  }
}

</mosaic_0001>

<bundles_post_ra>
// kernel: tpu_custom_call.1
= control target key start
LH: loop header
LB: loop body
LE: loop exit
PB: predicated region body
PF: predicated region fallthrough
CT: control target
= control target key end

     0   :  { %8 = vsyncpa [#allocation5], 0  ;;  %s1177_s0 = inlined_call_operand.hbm [shape: f32[8,128], index: 0, kind: input, shape index: {}]   ;;  %s1178_s1 = inlined_call_operand.vmem [shape: f32[8,3], index: 1, kind: input, shape index: {}]   ;;  %s1179_s2 = inlined_call_operand.vmem [shape: f32[2,4,256], index: 2, kind: input, shape index: {}]   ;;  %s1180_s3 = inlined_call_operand.hbm [shape: f32[2,8,256], index: 3, kind: output, shape index: {}]  }
   0x1   :  { %9 = vsyncpa [#allocation6], 0 }
   0x2   :  { %11 = vsyncpa [#allocation6 + $0x1], 0  ;;  %s1011_s12 = smov 0   ;;  %s1013_s13 = smov 0  }
   0x3   :  { %s1015_s14 = smov 0   ;;  %s1017_s15 = smov 0  }
   0x4 LB: > { %s1032_s16 = sadd.s32 4294967295, %s970_s15   ;;  %s684_s17 = sadd.s32 4294967294, %s970_s15   ;;  %s970_s15 = sphi %s1017_s15, %s1196_s15   ;;  %s966_s14 = sphi %s1015_s14, %s1195_s14   ;;  %s962_s13 = sphi %s1013_s13, %s1194_s13   ;;  %s958_s12 = sphi %s1011_s12, %s1193_s12  }
   0x5   : > { %s1036_s18 = sadd.s32 1, %s970_s15   ;;  %s92_s19 = sadd.s32 1, %s966_s14 }
   0x6   : > { %s89_s20 = ssub.s32 %s970_s15, %s1036_s18  ;;  %p102_p0 = scmp.ne.s32.totalorder %s966_s14, %s962_s13 }
   0x7   : > { %p90_p1 = scmp.eq.s32.totalorder %s89_s20, 0  ;;  %p103_p2 = scmp.eq.s32.totalorder %s1032_s16, 1 }
   0x8   : > { %p108_p3 = scmp.ne.s32.totalorder %s962_s13, %s958_s12  ;;  %p109_p4 = scmp.eq.s32.totalorder %s684_s17, 1 }
   0x9   : > { %s1047_s21 = scalar_select %p90_p1, %s966_s14, %s92_s19  }
   0xa   : > { %p1049_p5 = por %p103_p2, %p102_p0  ;;  %p1053_p6 = por %p109_p4, %p108_p3 }
   0xb   : > { %p685_p7 = scmp.ge.s32.totalorder %s970_s15, 1  ;;  %p116_p8 = scmp.lt.s32.totalorder %s970_s15, 3 }
   0xc   : > { %s1184_s22 = scalar_select %p1049_p5, 1, 0 }
   0xd   : > { %s1185_s23 = scalar_select %p1053_p6, 1, 0 }
   0xe   : > { %p1181_p9 = scmp.eq.s32.totalorder %s1032_s16, 0  ;;  %p1060_p10 = pnand %p685_p7, %p116_p8 }
   0xf   : > { %s972_s25 = smov [#allocation4]   ;;  %s876_s30 = scalar_lea.hbm %s1177_s0, 128 }
  0x10   : > { %s1186_s24 = scalar_select %p1060_p10, 1, 0 }
  0x11   : > { %s129_s26 = sshll.u32 %s972_s25, 4  ;;  %p738_p11 = pneg %p1060_p10  ;;  %s130_s26 = int_to_ptr.vmem [resolvable:$true] %s129_s26 }
  0x12   : > { %p877_p13 = scmp.ne.s32.totalorder %s1177_s0, %s876_s30  ;;  %p883_p3 = scmp.lt.u32.totalorder %s876_s30, %s1177_s0 }
  0x13   : > { %p1068_p12 = pnand %p1181_p9, %p738_p11 }
  0x15   : > { %p878_p0 = pneg %p1068_p12 }
  0x17   : > { %p879_p1 = pnand %p878_p0, %p877_p13 }
  0x19   : > { %p880_p2 = pneg %p879_p1 }
  0x1b   : > { %p885_p4 = pnand %p883_p3, %p880_p2 }
  0x1d   : > { %888 = shalt.err (!%p885_p4)
}
  0x1e   : > { %s889_s8 = scalar_lea.vmem %s130_s26, 128  ;;  %p897_p9 = scmp.lt.s32.totalorder %s130_s26, %s130_s26 }
  0x1f   : > { %p890_p7 = scmp.ne.s32.totalorder %s130_s26, %s889_s8  ;;  %p898_p6 = scmp.lt.s32.totalorder %s889_s8, %s889_s8 }
  0x21   : > { %p892_p8 = pnand %p890_p7, %p878_p0  ;;  %p899_p5 = por %p898_p6, %p897_p9 }
  0x23   : > { %p893_p11 = pneg %p892_p8 }
  0x25   : > { %p900_p10 = pnand %p899_p5, %p893_p11 }
  0x27   : > { %903 = shalt.err (!%p900_p10)
}
  0x28   : > { %741 = dma.hbm_to_vmem [thread:$0]  (!%p1068_p12), %s1177_s0, 128, %s130_s26, [#allocation5]  }
  0x29   : > { %p1188_p13 = scmp.ne.s32.totalorder %s1186_s24, 0 }
  0x2a   : > { %p1189_p1 = scmp.eq.s32.totalorder (!%p1188_p13), %s1032_s16, 0 }
  0x2b   : > { %153 = sbr.rel (%p1188_p13) target bundleno = 475 (0x1db), region = 32 }
  0x32   : > { %949 = dma.done.wait (%p1189_p1), [#allocation5], 128   ;;  %p1190_p0 = pmov %p1189_p1 }
  0x33   : > { %p177_p6 = scmp.lt.s32.totalorder %s1032_s16, 1  ;;  %v973_v0 = vmov 0.0   ;;  %s974_s25 = smov 125   ;;  %v987_v6 = vmov 0   ;;  %v513_v7 = vld [vmem:[%s1178_s1] sm:$0xff]  ;;  %vm226_vm0 = vcmask 1031168  }
  0x34   : > { %951 = vsyncadd (%p1190_p0), [#allocation5], 4294967168  ;;  %182 = vst [vmem:[#allocation2] sm:$0xff] %v973_v0  ;;  %583 = vmatprep.mubr.f32.mxu0 %v973_v0  ;;  %s975_s26 = smov 127   ;;  %s976_s27 = smov 111   ;;  %874 = vset.pattern.permute.xlu0 %v987_v6  ;;  %vm207_vm1 = vcmask 1039360  }
  0x35   : > { %183 = vst [vmem:[#allocation2 + $0x8] sm:$0xff] %v973_v0  ;;  %s178_s11 = scalar_select %p177_p6, %s1032_s16, 1  ;;  %vm245_vm2 = vcmask 1022976   ;;  %vm264_vm3 = vcmask 916480   ;;  %vm283_vm4 = vcmask 908288   ;;  %vm321_vm5 = vcmask 891904  }
  0x36   : > { %s977_s28 = smov 126   ;;  %s978_s29 = smov 112   ;;  %vm302_vm6 = vcmask 900096   ;;  %vm359_vm7 = vcmask 777216   ;;  %vm340_vm8 = vcmask 785408   ;;  %vm397_vm9 = vcmask 760832  }
  0x37   : > { %s698_s17 = sshll.u32 %s178_s11, 3  ;;  %s979_s30 = smov 109   ;;  %vm378_vm10 = vcmask 769024   ;;  %vm435_vm11 = vcmask 646144   ;;  %vm416_vm12 = vcmask 654336   ;;  %vm473_vm13 = vcmask 629760  }
  0x38   : > { %s181_s24 = scalar_lea.vmem %s1179_s2, %s698_s17  ;;  %s980_s4 = smov 110   ;;  %vm454_vm14 = vcmask 637952  }
  0x39   : > { %v185_v1 = vld [vmem:[%s181_s24] sm:$0xff]  ;;  %s981_s5 = smov 95   ;;  %s982_s6 = smov 96  }
  0x3a   : > { %v187_v2 = vcombine.high %v185_v1, %v185_v1  ;;  %189 = vst [vmem:[#allocation2] sm:$0xf] %v185_v1  ;;  %s983_s7 = smov 93   ;;  %s984_s8 = smov 94  }
  0x3b   : > { %s985_s9 = smov 79   ;;  %s986_s10 = smov 80  }
  0x3c   : > { %190 = vst [vmem:[#allocation2 + $0x8] sm:$0xf] %v187_v2  ;;  %s988_s11 = smov 77   ;;  %s989_s17 = smov 78  }
  0x3d   : > { %s174_s24 = sand.u32 1, %s962_s13   ;;  %p1191_p9 = scmp.ne.s32.totalorder %s1184_s22, 0 }
  0x41   : > { %v1099_v3 = vld [vmem:[#allocation2] sm:$0xff] }
  0x42   : > { %239 = vrot.lane.b32.xlu1 %v1099_v3, %s974_s25  ;;  %201 = vrot.lane.b32.xlu0 %v1099_v3, %s975_s26 }
  0x43   : > { %v1103_v4 = vld [vmem:[#allocation2 + $0x8] sm:$0xff] }
  0x44   : > { %v804_v5 = vpack.i.bf16 %v973_v0, %v1103_v4 }
  0x46   : > { %277 = vrot.lane.b32.xlu1 %v1099_v3, %s976_s27  ;;  %220 = vrot.lane.b32.xlu0 %v1099_v3, %s977_s28 }
  0x4a   : > { %805 = vrot.lane.b32.xlu1 %v804_v5, %s977_s28  ;;  %258 = vrot.lane.b32.xlu0 %v1099_v3, %s978_s29 }
  0x4e   : > { %810 = vrot.lane.b32.xlu1 %v804_v5, %s974_s25  ;;  %800 = vrot.lane.b32.xlu0 %v804_v5, %s975_s26  ;;  %s690_s25 = sshll.u32 %s174_s24, 4  ;;  %s699_s26 = sshll.u32 %s1032_s16, 8 }
  0x4f   : > { %s599_s16 = scalar_lea.sflag [#allocation6], %s174_s24 }
  0x52   : > { %820 = vrot.lane.b32.xlu1 %v804_v5, %s976_s27  ;;  %815 = vrot.lane.b32.xlu0 %v804_v5, %s978_s29  ;;  %s176_s27 = scalar_lea.vmem [#allocation7], %s690_s25 }
  0x53   : > { %s613_s28 = sshll.u32 %s176_s27, 4  ;;  %s1137_s28 = int_to_ptr.vmem [resolvable:$true] %s613_s28 }
  0x56   : > { %830 = vrot.lane.b32.xlu1 %v804_v5, %s979_s30  ;;  %825 = vrot.lane.b32.xlu0 %v804_v5, %s980_s4 }
  0x5a   : > { %315 = vrot.lane.b32.xlu1 %v1099_v3, %s979_s30  ;;  %296 = vrot.lane.b32.xlu0 %v1099_v3, %s980_s4  ;;  %s1135_s4 = scalar_lea.hbm %s1180_s3, %s699_s26 }
  0x5e   : > { %840 = vrot.lane.b32.xlu1 %v804_v5, %s981_s5  ;;  %835 = vrot.lane.b32.xlu0 %v804_v5, %s982_s6 }
  0x62   : > { %353 = vrot.lane.b32.xlu1 %v1099_v3, %s981_s5  ;;  %334 = vrot.lane.b32.xlu0 %v1099_v3, %s982_s6  ;;  %s904_s5 = scalar_lea.vmem %s1137_s28, 256  ;;  %s990_s6 = smov [#allocation7]  }
  0x63   : > { %p905_p5 = scmp.ne.s32.totalorder %s1137_s28, %s904_s5 }
  0x65   : > { %p906_p10 = pnand %p905_p5, %p1191_p9 }
  0x66   : > { %850 = vrot.lane.b32.xlu1 %v804_v5, %s983_s7  ;;  %845 = vrot.lane.b32.xlu0 %v804_v5, %s984_s8 }
  0x67   : > { %p907_p12 = pneg %p906_p10 }
  0x6a   : > { %391 = vrot.lane.b32.xlu1 %v1099_v3, %s983_s7  ;;  %372 = vrot.lane.b32.xlu0 %v1099_v3, %s984_s8  ;;  %s908_s7 = sshll.u32 %s990_s6, 4  ;;  %s909_s7 = int_to_ptr.vmem [resolvable:$false] %s908_s7 }
  0x6b   : > { %s910_s8 = scalar_lea.vmem %s909_s7, 512  ;;  %p911_p2 = scmp.lt.s32.totalorder %s1137_s28, %s909_s7 }
  0x6c   : > { %p912_p3 = scmp.lt.s32.totalorder %s910_s8, %s904_s5 }
  0x6e   : > { %860 = vrot.lane.b32.xlu1 %v804_v5, %s985_s9  ;;  %855 = vrot.lane.b32.xlu0 %v804_v5, %s986_s10  ;;  %p913_p4 = por %p912_p3, %p911_p2 }
  0x70   : > { %p914_p7 = pnand %p913_p4, %p907_p12 }
  0x72   : > { %429 = vrot.lane.b32.xlu1 %v1099_v3, %s985_s9  ;;  %410 = vrot.lane.b32.xlu0 %v1099_v3, %s986_s10 }
  0x76   : > { %870 = vrot.lane.b32.xlu1 %v804_v5, %s988_s11  ;;  %865 = vrot.lane.b32.xlu0 %v804_v5, %s989_s17 }
  0x7a   : > { %467 = vrot.lane.b32.xlu1 %v1099_v3, %s988_s11  ;;  %448 = vrot.lane.b32.xlu0 %v1099_v3, %s989_s17 }
  0x7e   : > { %516 = vperm.xlu0 %874, %v513_v7  }
  0xb4   : > { %v240_v8 = vpop.permute.xlu1 %239  ;;  %v202_v9 = vpop.permute.xlu0 %201 }
  0xb8   : > { %v278_v10 = vpop.permute.xlu1 %277  ;;  %v221_v11 = vpop.permute.xlu0 %220 }
  0xbc   : > { %v806_v12 = vpop.permute.xlu1 %805  ;;  %v259_v13 = vpop.permute.xlu0 %258 }
  0xbd   : > { %v808_v14 = vunpack.i.h.bf16 %v806_v12  ;;  %v807_v15 = vunpack.i.l.bf16 %v806_v12 }
  0xbf   : > { %v228_v29 = vsel %vm226_vm0, %v807_v15, %v808_v14  ;;  %v227_v36 = vsel %vm226_vm0, %v221_v11, %v807_v15 }
  0xc0   : > { %v811_v16 = vpop.permute.xlu1 %810  ;;  %v801_v17 = vpop.permute.xlu0 %800 }
  0xc1   : > { %v813_v18 = vunpack.i.h.bf16 %v811_v16  ;;  %v812_v19 = vunpack.i.l.bf16 %v811_v16  ;;  %v803_v20 = vunpack.i.h.bf16 %v801_v17  ;;  %v802_v21 = vunpack.i.l.bf16 %v801_v17 }
  0xc3   : > { %v209_v22 = vsel %vm207_vm1, %v802_v21, %v803_v20  ;;  %v208_v23 = vsel %vm207_vm1, %v202_v9, %v802_v21  ;;  %v247_v24 = vsel %vm245_vm2, %v812_v19, %v813_v18  ;;  %v246_v30 = vsel %vm245_vm2, %v240_v8, %v812_v19 }
  0xc4   : > { %v821_v25 = vpop.permute.xlu1 %820  ;;  %v816_v26 = vpop.permute.xlu0 %815  ;;  %v700_v27 = vpack.c.bf16 %v209_v22, %v1103_v4  ;;  %v702_v28 = vpack.c.bf16 %v208_v23, %v1099_v3  ;;  %v704_v35 = vpack.c.bf16 %v247_v24, %v228_v29  ;;  %v706_v41 = vpack.c.bf16 %v246_v30, %v227_v36 }
  0xc5   : > { %v823_v31 = vunpack.i.h.bf16 %v821_v25  ;;  %v822_v32 = vunpack.i.l.bf16 %v821_v25  ;;  %v818_v33 = vunpack.i.h.bf16 %v816_v26  ;;  %v817_v34 = vunpack.i.l.bf16 %v816_v26 }
  0xc6   : > { %701 = vmatprep.subr.bf16.mxu0 %v700_v27 }
  0xc7   : > { %703 = vmatpush1.bf16.msra.mxu0 %v702_v28  ;;  %v266_v37 = vsel %vm264_vm3, %v817_v34, %v818_v33  ;;  %v285_v38 = vsel %vm283_vm4, %v822_v32, %v823_v31  ;;  %v265_v47 = vsel %vm264_vm3, %v259_v13, %v817_v34  ;;  %v284_v48 = vsel %vm283_vm4, %v278_v10, %v822_v32 }
  0xc8   : > { %v831_v39 = vpop.permute.xlu1 %830  ;;  %v826_v40 = vpop.permute.xlu0 %825  ;;  %705 = vmatprep.subr.bf16.mxu0 %v704_v35  ;;  %v708_v46 = vpack.c.bf16 %v285_v38, %v266_v37  ;;  %v710_v55 = vpack.c.bf16 %v284_v48, %v265_v47 }
  0xc9   : > { %v833_v42 = vunpack.i.h.bf16 %v831_v39  ;;  %v832_v43 = vunpack.i.l.bf16 %v831_v39  ;;  %v828_v44 = vunpack.i.h.bf16 %v826_v40  ;;  %v827_v45 = vunpack.i.l.bf16 %v826_v40 }
  0xcb   : > { %707 = vmatpush1.bf16.msra.mxu0 %v706_v41  ;;  %v304_v49 = vsel %vm302_vm6, %v827_v45, %v828_v44  ;;  %v323_v50 = vsel %vm321_vm5, %v832_v43, %v833_v42 }
  0xcc   : > { %v316_v51 = vpop.permute.xlu1 %315  ;;  %v297_v52 = vpop.permute.xlu0 %296  ;;  %709 = vmatprep.subr.bf16.mxu0 %v708_v46  ;;  %v712_v56 = vpack.c.bf16 %v323_v50, %v304_v49  ;;  %v480_v50 = vld [vmem:[#allocation4] sm:$0xff] }
  0xcd   : > { %v322_v53 = vsel %vm321_vm5, %v316_v51, %v832_v43  ;;  %v303_v54 = vsel %vm302_vm6, %v297_v52, %v827_v45 }
  0xce   : > { %v714_v57 = vpack.c.bf16 %v322_v53, %v303_v54 }
  0xcf   : > { %711 = vmatpush1.bf16.msra.mxu0 %v710_v55 }
  0xd0   : > { %v841_v58 = vpop.permute.xlu1 %840  ;;  %v836_v59 = vpop.permute.xlu0 %835  ;;  %713 = vmatprep.subr.bf16.mxu0 %v712_v56 }
  0xd1   : > { %v843_v60 = vunpack.i.h.bf16 %v841_v58  ;;  %v842_v61 = vunpack.i.l.bf16 %v841_v58  ;;  %v838_v62 = vunpack.i.h.bf16 %v836_v59  ;;  %v837_v63 = vunpack.i.l.bf16 %v836_v59 }
  0xd3   : > { %715 = vmatpush1.bf16.msra.mxu0 %v714_v57  ;;  %v342_v0 = vsel %vm340_vm8, %v837_v63, %v838_v62  ;;  %v361_v1 = vsel %vm359_vm7, %v842_v61, %v843_v60 }
  0xd4   : > { %v354_v2 = vpop.permute.xlu1 %353  ;;  %v335_v3 = vpop.permute.xlu0 %334  ;;  %v716_v4 = vpack.c.bf16 %v361_v1, %v342_v0 }
  0xd5   : > { %v360_v5 = vsel %vm359_vm7, %v354_v2, %v842_v61  ;;  %v341_v6 = vsel %vm340_vm8, %v335_v3, %v837_v63 }
  0xd6   : > { %v718_v7 = vpack.c.bf16 %v360_v5, %v341_v6  ;;  %717 = vmatprep.subr.bf16.mxu0 %v716_v4 }
  0xd8   : > { %v851_v8 = vpop.permute.xlu1 %850  ;;  %v846_v9 = vpop.permute.xlu0 %845  ;;  %719 = vmatpush1.bf16.msra.mxu0 %v718_v7 }
  0xd9   : > { %v853_v10 = vunpack.i.h.bf16 %v851_v8  ;;  %v852_v11 = vunpack.i.l.bf16 %v851_v8  ;;  %v848_v12 = vunpack.i.h.bf16 %v846_v9  ;;  %v847_v13 = vunpack.i.l.bf16 %v846_v9 }
  0xdb   : > { %v380_v14 = vsel %vm378_vm10, %v847_v13, %v848_v12  ;;  %v399_v15 = vsel %vm397_vm9, %v852_v11, %v853_v10 }
  0xdc   : > { %v392_v16 = vpop.permute.xlu1 %391  ;;  %v373_v17 = vpop.permute.xlu0 %372  ;;  %v720_v18 = vpack.c.bf16 %v399_v15, %v380_v14 }
  0xdd   : > { %v398_v19 = vsel %vm397_vm9, %v392_v16, %v852_v11  ;;  %v379_v20 = vsel %vm378_vm10, %v373_v17, %v847_v13 }
  0xde   : > { %v722_v21 = vpack.c.bf16 %v398_v19, %v379_v20  ;;  %721 = vmatprep.subr.bf16.mxu0 %v720_v18 }
  0xe0   : > { %v861_v22 = vpop.permute.xlu1 %860  ;;  %v856_v23 = vpop.permute.xlu0 %855  ;;  %723 = vmatpush1.bf16.msra.mxu0 %v722_v21 }
  0xe1   : > { %v863_v24 = vunpack.i.h.bf16 %v861_v22  ;;  %v862_v25 = vunpack.i.l.bf16 %v861_v22  ;;  %v858_v26 = vunpack.i.h.bf16 %v856_v23  ;;  %v857_v27 = vunpack.i.l.bf16 %v856_v23 }
  0xe3   : > { %v418_v28 = vsel %vm416_vm12, %v857_v27, %v858_v26  ;;  %v437_v29 = vsel %vm435_vm11, %v862_v25, %v863_v24 }
  0xe4   : > { %v430_v30 = vpop.permute.xlu1 %429  ;;  %v411_v31 = vpop.permute.xlu0 %410  ;;  %v724_v32 = vpack.c.bf16 %v437_v29, %v418_v28 }
  0xe5   : > { %v436_v33 = vsel %vm435_vm11, %v430_v30, %v862_v25  ;;  %v417_v34 = vsel %vm416_vm12, %v411_v31, %v857_v27 }
  0xe6   : > { %v726_v35 = vpack.c.bf16 %v436_v33, %v417_v34  ;;  %725 = vmatprep.subr.bf16.mxu0 %v724_v32 }
  0xe8   : > { %v871_v36 = vpop.permute.xlu1 %870  ;;  %v866_v37 = vpop.permute.xlu0 %865  ;;  %727 = vmatpush1.bf16.msra.mxu0 %v726_v35 }
  0xe9   : > { %v873_v38 = vunpack.i.h.bf16 %v871_v36  ;;  %v872_v39 = vunpack.i.l.bf16 %v871_v36  ;;  %v868_v40 = vunpack.i.h.bf16 %v866_v37  ;;  %v867_v41 = vunpack.i.l.bf16 %v866_v37 }
  0xeb   : > { %v456_v42 = vsel %vm454_vm14, %v867_v41, %v868_v40  ;;  %v475_v43 = vsel %vm473_vm13, %v872_v39, %v873_v38 }
  0xec   : > { %v468_v44 = vpop.permute.xlu1 %467  ;;  %v449_v45 = vpop.permute.xlu0 %448  ;;  %v728_v46 = vpack.c.bf16 %v475_v43, %v456_v42 }
  0xed   : > { %v474_v47 = vsel %vm473_vm13, %v468_v44, %v872_v39  ;;  %v455_v48 = vsel %vm454_vm14, %v449_v45, %v867_v41 }
  0xee   : > { %v730_v49 = vpack.c.bf16 %v474_v47, %v455_v48  ;;  %729 = vmatprep.subr.bf16.mxu0 %v728_v46 }
  0xf0   : > { %731 = vmatpush1.bf16.msra.mxu0 %v730_v49 }
  0xf3   : > { %584 = vmatmul.mubr.f32.vlgmr.msra.gmra.mrb[0].mxu0 %v480_v50 }
  0xfd   : > { %v517_v51 = vpop.permute.xlu0 %516 }
 0x1c6   : > { %v585_v52 = vpop.f32.mrb[0].mxu0 }
 0x1c7   : > { %v586_v53 = vadd.f32 %v585_v52, %v517_v51  ;;  %v587_v54 = vpop.f32.mrb[1].mxu0 }
 0x1c8   : > { %v588_v55 = vadd.f32 %v587_v54, %v517_v51 }
 0x1c9   : > { %vm590_vm15 = vcmp.gt.f32.partialorder %v586_v53, 0.0  ;;  %v592_v56 = vmul.f32 0.2, %v586_v53 }
 0x1ca   : > { %vm591_vm0 = vcmp.gt.f32.partialorder %v588_v55, 0.0  ;;  %v593_v57 = vmul.f32 0.2, %v588_v55 }
 0x1cb   : > { %v594_v58 = vsel %vm590_vm15, %v586_v53, %v592_v56 }
 0x1cc   : > { %596 = vst [vmem:[%s176_s27] sm:$0xff] %v594_v58  ;;  %v595_v59 = vsel %vm591_vm0, %v588_v55, %v593_v57 }
 0x1cd   : > { %597 = vst [vmem:[%s176_s27 + $0x8] sm:$0xff] %v595_v59 }
 0x1ce   : > { %917 = shalt.err (!%p914_p7)
}
 0x1cf   : > { %s918_s9 = scalar_lea.hbm %s1135_s4, 256  ;;  %s922_s17 = scalar_lea.hbm %s1180_s3, 512 }
 0x1d0   : > { %p919_p8 = scmp.ne.s32.totalorder %s1135_s4, %s918_s9  ;;  %p923_p1 = scmp.lt.u32.totalorder %s1135_s4, %s1180_s3 }
 0x1d1   : > { %p924_p0 = scmp.lt.u32.totalorder %s922_s17, %s918_s9  ;;  %p926_p5 = scmp.lt.u32.totalorder %s918_s9, %s1135_s4 }
 0x1d2   : > { %p920_p11 = pnand %p919_p8, %p1191_p9 }
 0x1d3   : > { %p925_p6 = por %p924_p0, %p923_p1 }
 0x1d4   : > { %p921_p13 = pneg %p920_p11 }
 0x1d5   : > { %p927_p10 = por %p926_p5, %p925_p6 }
 0x1d7   : > { %p928_p12 = pnand %p927_p10, %p921_p13 }
 0x1d9   : > { %931 = shalt.err (!%p928_p12)
}
 0x1da   : > { %736 = dma.vmem_to_hbm [thread:$0]  (%p1191_p9), %s1137_s28, 256, %s1135_s4, %s599_s16  }
 0x1db PF: > { %p748_p2 = scmp.ge.s32.totalorder %s970_s15, 2  ;;  %s625_s24 = sand.u32 1, %s958_s12  }
 0x1dc   : > { %p1192_p3 = scmp.ne.s32.totalorder %s1185_s23, 0  ;;  %s626_s25 = scalar_lea.sflag [#allocation6], %s625_s24 }
 0x1de   : > { %p743_p4 = pnand %p748_p2, %p1192_p3 }
 0x1e0   : > { %953 = dma.done.wait (!%p743_p4), %s626_s25, 256  }
 0x1e1   : > { %955 = vsyncadd (!%p743_p4), %s626_s25, 4294967040  ;;  %p14_p7 = scmp.ge.s32.totalorder %s1036_s18, 4   ;;  %s1193_s12 = smov %s962_s13 }
 0x1e2   : > { %s1194_s13 = smov %s966_s14  ;;  %s1195_s14 = smov %s1047_s21 }
 0x1e3   : > { %s1196_s15 = smov %s1036_s18  ;;  %16 = sbr.rel (!%p14_p7) target bundleno = 4 (0x4), region = 72 }
 0x1ea   :  { %631 = vsyncpa [#allocation5], 1 }
 0x1eb   :  { %633 = vsyncpa [#allocation5 + $0x1], 1 }
 0x1ec   :  { %634 = vsyncpa [#allocation6], 1 }
 0x1ed   :  { %636 = vsyncpa [#allocation6 + $0x1], 1 }

</bundles_post_ra>
